<compile_context>
chip_gen: v6e
topology: v6e:2x2x1
jax: 0.10.0
libtpu: 0.0.40
codegen_flags: <defaults>
</compile_context>

<pallas_src>
import jax
import jax.numpy as jnp
from jax import lax
from jax.experimental import pallas as pl
from jax.experimental.pallas import tpu as pltpu


def _round_up(x: int, m: int) -> int:
    return (x + m - 1) // m * m


def _head_kernel(x_ref, w_ref, b_ref, o_ref, acc_ref):
    # x_ref: (tm, tk)  w_ref: (tn, tk)  b_ref: (1, tn)  o_ref: (tm, tn)
    # acc_ref: (tm, tn) f32 scratch, resident across the K axis.
    k = pl.program_id(2)

    @pl.when(k == 0)
    def _():
        acc_ref[...] = jnp.zeros_like(acc_ref)

    # Contract x (tm, tk) with W (tn, tk) over their last axes -> (tm, tn).
    acc_ref[...] += lax.dot_general(
        x_ref[...], w_ref[...],
        dimension_numbers=(((1,), (1,)), ((), ())),
        preferred_element_type=jnp.float32)

    @pl.when(k == pl.num_programs(2) - 1)
    def _():
        o_ref[...] = (acc_ref[...]
                      + b_ref[...].astype(jnp.float32)).astype(o_ref.dtype)


def classification_head(x, weight, bias, *, tm=256, tn=512, tk=512):
    """
    x:      [B, C, H, W] (or any [B, ...]) — flattened row-major like torch view(B, -1)
    weight: [target_dim, input_dim]  (PyTorch nn.Linear convention, used as-is)
    bias:   [target_dim]
    returns [B, target_dim]
    """
    B = x.shape[0]
    x_flat = x.reshape(B, -1)
    D = x_flat.shape[1]
    T = weight.shape[0]
    assert weight.shape == (T, D), (weight.shape, (T, D))
    assert bias.shape == (T,), (bias.shape, (T,))

    dtype = x_flat.dtype
    itemsize = jnp.dtype(dtype).itemsize

    # Tile sizes: clamp to the (aligned) problem, keep 8-sublane / 128-lane
    # alignment.  For large heads these stay at the defaults.
    tm = max(8, min(tm, _round_up(B, 8)))
    tn = max(128, min(tn, _round_up(T, 128)))
    tk = max(128, min(tk, _round_up(D, 128)))

    # Pad each dim up to a multiple of its tile so the grid covers it exactly.
    B_pad = _round_up(B, tm)
    T_pad = _round_up(T, tn)
    D_pad = _round_up(D, tk)

    if (B_pad, D_pad) != (B, D):
        x_flat = jnp.pad(x_flat, ((0, B_pad - B), (0, D_pad - D)))
    w = weight
    if (T_pad, D_pad) != (T, D):
        w = jnp.pad(w, ((0, T_pad - T), (0, D_pad - D)))
    b2 = bias.reshape(1, T)
    if T_pad != T:
        b2 = jnp.pad(b2, ((0, 0), (0, T_pad - T)))

    grid = (B_pad // tm, T_pad // tn, D_pad // tk)

    # Scoped-VMEM budget: double-buffered input tiles + output tile + f32 acc.
    tile_bytes = (2 * (tm * tk + tn * tk + tn) * itemsize
                  + 2 * tm * tn * itemsize
                  + tm * tn * 4)
    vmem_limit = int(min(64 * 2**20, max(32 * 2**20, 2 * tile_bytes)))

    cost = pl.CostEstimate(
        flops=2 * B_pad * D_pad * T_pad,
        transcendentals=0,
        bytes_accessed=(B_pad * D_pad + T_pad * D_pad + T_pad + B_pad * T_pad)
        * itemsize,
    )

    out = pl.pallas_call(
        _head_kernel,
        out_shape=jax.ShapeDtypeStruct((B_pad, T_pad), dtype),
        grid_spec=pltpu.PrefetchScalarGridSpec(
            num_scalar_prefetch=0,
            grid=grid,
            in_specs=[
                pl.BlockSpec((tm, tk), lambda i, j, k: (i, k)),   # x tile
                pl.BlockSpec((tn, tk), lambda i, j, k: (j, k)),   # W tile (native [T, D])
                pl.BlockSpec((1, tn), lambda i, j, k: (0, j)),    # bias tile (k-invariant)
            ],
            out_specs=pl.BlockSpec((tm, tn), lambda i, j, k: (i, j)),
            scratch_shapes=[pltpu.VMEM((tm, tn), jnp.float32)],
        ),
        compiler_params=pltpu.CompilerParams(
            dimension_semantics=("parallel", "parallel", "arbitrary"),
            vmem_limit_bytes=vmem_limit,
        ),
        cost_estimate=cost,
    )(x_flat, w, b2)

    # Strip padding.
    return out[:B, :T]


def _init_linear_params(key, input_dim, target_dim, dtype=jnp.float32):
    # Mimic torch.nn.Linear default init: U(-1/sqrt(in), 1/sqrt(in)).
    kw, kb = jax.random.split(key)
    bound = 1.0 / (input_dim ** 0.5)
    weight = jax.random.uniform(kw, (target_dim, input_dim), dtype,
                                minval=-bound, maxval=bound)
    bias = jax.random.uniform(kb, (target_dim,), dtype,
                              minval=-bound, maxval=bound)
    return weight, bias


if __name__ == "__main__":
    key = jax.random.PRNGKey(0)
    kx, kp = jax.random.split(key)

    B, C, H, W = 2, 4, 16, 16
    input_dim = C * H * W          # 1024
    target_dim = 10

    x = jax.random.normal(kx, (B, C, H, W), jnp.float32)
    weight, bias = _init_linear_params(kp, input_dim, target_dim)

    y = classification_head(x, weight, bias)
    y = jax.block_until_ready(y)

    # Reference check in plain JAX (matches torch: x.view(B,-1) @ W.T + b).
    y_ref = x.reshape(B, -1) @ weight.T + bias
    assert y.shape == (B, target_dim)
    assert jnp.allclose(y, y_ref, atol=1e-4, rtol=1e-4), float(
        jnp.max(jnp.abs(y - y_ref)))

    print("KERNEL_OK")
</pallas_src>

<mosaic_0001>
module attributes {stable_mosaic.version = 11 : i64} {
  func.func @_head_kernel(%arg0: i32, %arg1: i32, %arg2: i32, %arg3: memref<8x512xf32, #tpu.memory_space<vmem>>, %arg4: memref<128x512xf32, #tpu.memory_space<vmem>>, %arg5: memref<1x128xf32, #tpu.memory_space<vmem>>, %arg6: memref<8x128xf32, #tpu.memory_space<vmem>>, %arg7: memref<8x128xf32, #tpu.memory_space<vmem>>) attributes {dimension_semantics = [#tpu.dimension_semantics<parallel>, #tpu.dimension_semantics<parallel>, #tpu.dimension_semantics<arbitrary>], iteration_bounds = array<i64: 1, 1, 2>, scalar_prefetch = 0 : i64, scratch_operands = 1 : i64, tpu.core_type = #tpu.core_type<tc>, window_params = [{transform_indices = @transform_0, window_bounds = array<i64: 8, 512>}, {transform_indices = @transform_1, window_bounds = array<i64: 128, 512>}, {transform_indices = @transform_2, window_bounds = array<i64: 1, 128>}, {transform_indices = @transform_3, window_bounds = array<i64: 8, 128>}]} {
    %c0_i32 = arith.constant 0 : i32
    %0 = arith.cmpi eq, %arg2, %c0_i32 : i32
    %1 = arith.extui %0 : i1 to i32
    %c0_i32_0 = arith.constant 0 : i32
    %2 = arith.cmpi ne, %1, %c0_i32_0 : i32
    scf.if %2 {
      %cst_9 = arith.constant 0.000000e+00 : f32
      %12 = vector.broadcast %cst_9 : f32 to vector<8x128xf32>
      %c0_10 = arith.constant 0 : index
      %c0_11 = arith.constant 0 : index
      %13 = vector.load %arg7[%c0_10, %c0_11] : memref<8x128xf32, #tpu.memory_space<vmem>>, vector<8x128xf32>
      tpu.vector_store %arg7[%c0_10, %c0_11], %12 {strides = array<i32>} : memref<8x128xf32, #tpu.memory_space<vmem>>, vector<8x128xf32>,
    } else {
    }
    %c0 = arith.constant 0 : index
    %c0_1 = arith.constant 0 : index
    %3 = vector.load %arg7[%c0, %c0_1] : memref<8x128xf32, #tpu.memory_space<vmem>>, vector<8x128xf32>
    %c0_2 = arith.constant 0 : index
    %c0_3 = arith.constant 0 : index
    %4 = vector.load %arg3[%c0_2, %c0_3] : memref<8x512xf32, #tpu.memory_space<vmem>>, vector<8x512xf32>
    %c0_4 = arith.constant 0 : index
    %c0_5 = arith.constant 0 : index
    %5 = vector.load %arg4[%c0_4, %c0_5] : memref<128x512xf32, #tpu.memory_space<vmem>>, vector<128x512xf32>
    %cst = arith.constant dense<0.000000e+00> : vector<8x128xf32>
    %6 = tpu.matmul %4, %5, %cst {dimension_numbers = #tpu.dot_dimension_numbers<[1], [1], [0], [0], [0, 0, 1, 0], [], []>} : vector<8x512xf32>, vector<128x512xf32>, vector<8x128xf32> -> vector<8x128xf32>
    %7 = arith.addf %3, %6 : vector<8x128xf32>
    %c0_6 = arith.constant 0 : index
    %c0_7 = arith.constant 0 : index
    %8 = vector.load %arg7[%c0_6, %c0_7] : memref<8x128xf32, #tpu.memory_space<vmem>>, vector<8x128xf32>
    tpu.vector_store %arg7[%c0_6, %c0_7], %7 {strides = array<i32>} : memref<8x128xf32, #tpu.memory_space<vmem>>, vector<8x128xf32>,
    %c1_i32 = arith.constant 1 : i32
    %9 = arith.cmpi eq, %arg2, %c1_i32 : i32
    %10 = arith.extui %9 : i1 to i32
    %c0_i32_8 = arith.constant 0 : i32
    %11 = arith.cmpi ne, %10, %c0_i32_8 : i32
    scf.if %11 {
      %c0_9 = arith.constant 0 : index
      %c0_10 = arith.constant 0 : index
      %12 = vector.load %arg7[%c0_9, %c0_10] : memref<8x128xf32, #tpu.memory_space<vmem>>, vector<8x128xf32>
      %c0_11 = arith.constant 0 : index
      %c0_12 = arith.constant 0 : index
      %13 = vector.load %arg5[%c0_11, %c0_12] : memref<1x128xf32, #tpu.memory_space<vmem>>, vector<1x128xf32>
      %14 = vector.broadcast %13 : vector<1x128xf32> to vector<8x128xf32>
      %15 = arith.addf %12, %14 : vector<8x128xf32>
      %c0_13 = arith.constant 0 : index
      %c0_14 = arith.constant 0 : index
      %16 = vector.load %arg6[%c0_13, %c0_14] : memref<8x128xf32, #tpu.memory_space<vmem>>, vector<8x128xf32>
      tpu.vector_store %arg6[%c0_13, %c0_14], %15 {strides = array<i32>} : memref<8x128xf32, #tpu.memory_space<vmem>>, vector<8x128xf32>,
    } else {
    }
    return
  }
  func.func @transform_0(%arg0: i32, %arg1: i32, %arg2: i32) -> (i32, i32) {
    %c0_i32 = arith.constant 0 : i32
    return %arg0, %arg2 : i32, i32
  }
  func.func @transform_1(%arg0: i32, %arg1: i32, %arg2: i32) -> (i32, i32) {
    %c0_i32 = arith.constant 0 : i32
    return %arg1, %arg2 : i32, i32
  }
  func.func @transform_2(%arg0: i32, %arg1: i32, %arg2: i32) -> (i32, i32) {
    %c0_i32 = arith.constant 0 : i32
    %c0_i32_0 = arith.constant 0 : i32
    return %c0_i32, %arg1 : i32, i32
  }
  func.func @transform_3(%arg0: i32, %arg1: i32, %arg2: i32) -> (i32, i32) {
    %c0_i32 = arith.constant 0 : i32
    return %arg0, %arg1 : i32, i32
  }
}

</mosaic_0001>

<bundles_post_ra>
// kernel: tpu_custom_call.1
= control target key start
LH: loop header
LB: loop body
LE: loop exit
PB: predicated region body
PF: predicated region fallthrough
CT: control target
= control target key end

     0   :  { %8 = vsyncpa [#allocation4], 0  ;;  %s1087_s0 = inlined_call_operand.hbm [shape: f32[8,1024], index: 0, kind: input, shape index: {}]   ;;  %s1088_s1 = inlined_call_operand.hbm [shape: f32[128,1024], index: 1, kind: input, shape index: {}]   ;;  %s1089_s2 = inlined_call_operand.vmem [shape: f32[1,128], index: 2, kind: input, shape index: {}]   ;;  %s1090_s3 = inlined_call_operand.hbm [shape: f32[8,128], index: 3, kind: output, shape index: {}]  }
   0x1   :  { %10 = vsyncpa [#allocation4 + $0x1], 0 }
   0x2   :  { %11 = vsyncpa [#allocation7], 0 }
   0x3   :  { %13 = vsyncpa [#allocation7 + $0x1], 0 }
   0x4   :  { %14 = vsyncpa [#allocation5], 0  ;;  %s873_s12 = smov 0   ;;  %s875_s13 = smov 0  }
   0x5   :  { %s877_s14 = smov 0   ;;  %s879_s15 = smov 0  }
   0x6   :  { %s881_s16 = smov 0   ;;  %s883_s17 = smov 0  }
   0x7 LB: > { %s613_s18 = sadd.s32 4294967295, %s844_s17   ;;  %s32_s19 = sadd.s32 1, %s840_s16  ;;  %s844_s17 = sphi %s883_s17, %s20_s17   ;;  %s840_s16 = sphi %s881_s16, %s1100_s16   ;;  %s836_s15 = sphi %s879_s15, %s1099_s15   ;;  %s832_s14 = sphi %s877_s14, %s1098_s14   ;;  %s828_s13 = sphi %s875_s13, %s1097_s13   ;;  %s824_s12 = sphi %s873_s12, %s1096_s12  }
   0x8   : > { %p33_p0 = scmp.ge.s32.totalorder %s32_s19, 2  ;;  %s48_s20 = sadd.s32 1, %s832_s14 }
   0x9   : > { %p55_p1 = scmp.ne.s32.totalorder %s832_s14, %s828_s13  ;;  %p56_p2 = scmp.eq.s32.totalorder %s844_s17, 0 }
   0xa   : > { %s1102_s19 = smov (%p33_p0, %s32_s19), 0  ;;  %p61_p4 = scmp.ne.s32.totalorder %s828_s13, %s824_s12 }
   0xb   : > { %p909_p3 = por %p56_p2, %p55_p1  ;;  %s44_s22 = ssub.s32 %s840_s16, %s1102_s19 }
   0xc   : > { %p62_p5 = scmp.eq.s32.totalorder %s613_s18, 0  ;;  %p46_p6 = scmp.eq.s32.totalorder %s44_s22, 0 }
   0xd   : > { %p650_p8 = scmp.lt.s32.totalorder %s844_s17, 2  ;;  %s927_s25 = sand.u32 1, %s832_s14  }
   0xe   : > { %p918_p7 = por %p62_p5, %p61_p4  ;;  %s633_s26 = sshll.u32 %s840_s16, 9 }
   0xf   : > { %s924_s24 = scalar_select %p46_p6, %s832_s14, %s48_s20  }
  0x10   : > { %s617_s27 = sshll.u32 %s927_s25, 5  ;;  %s185_s30 = scalar_lea.hbm %s1087_s0, %s633_s26 }
  0x11   : > { %s177_s4 = scalar_lea.vmem [#allocation3], %s617_s27  ;;  %p936_p9 = pnand %p650_p8, %p909_p3 }
  0x12   : > { %s187_s5 = sshll.u32 %s177_s4, 4  ;;  %s620_s7 = sshll.u32 %s927_s25, 9  ;;  %s188_s5 = int_to_ptr.vmem [resolvable:$true] %s187_s5 }
  0x13   : > { %s174_s8 = scalar_lea.sflag [#allocation4], %s927_s25  ;;  %p708_p10 = pneg %p936_p9 }
  0x14   : > { %s719_s9 = scalar_lea.vmem %s188_s5, 512  ;;  %s846_s10 = smov [#allocation3]  }
  0x15   : > { %p720_p11 = scmp.ne.s32.totalorder %s188_s5, %s719_s9  ;;  %s724_s11 = sshll.u32 %s846_s10, 4  ;;  %s725_s11 = int_to_ptr.vmem [resolvable:$false] %s724_s11 }
  0x16   : > { %s726_s12 = scalar_lea.vmem %s725_s11, 1024  ;;  %p727_p0 = scmp.lt.s32.totalorder %s188_s5, %s725_s11 }
  0x17   : > { %p722_p12 = pnand %p720_p11, %p708_p10  ;;  %p728_p1 = scmp.lt.s32.totalorder %s726_s12, %s719_s9 }
  0x19   : > { %p723_p13 = pneg %p722_p12  ;;  %p729_p2 = por %p728_p1, %p727_p0 }
  0x1b   : > { %p730_p3 = pnand %p729_p2, %p723_p13 }
  0x1d   : > { %733 = shalt.err (!%p730_p3)
}
  0x1e   : > { %646 = dma.hbm_to_vmem [thread:$0]  (!%p936_p9), %s185_s30, 512, %s188_s5, %s174_s8  }
  0x1f   : > { %s207_s22 = scalar_lea.hbm %s1088_s1, %s633_s26  ;;  %p623_p4 = scmp.ge.s32.totalorder %s844_s17, 1 }
  0x20   : > { %p216_p5 = scmp.lt.s32.totalorder %s844_s17, 3  ;;  %s198_s27 = scalar_lea.vmem [#allocation6], %s620_s7 }
  0x21   : > { %s208_s28 = sshll.u32 %s198_s27, 4  ;;  %s195_s4 = scalar_lea.sflag [#allocation7], %s927_s25  ;;  %s209_s28 = int_to_ptr.vmem [resolvable:$true] %s208_s28 }
  0x22   : > { %p954_p6 = pnand %p623_p4, %p216_p5  ;;  %s747_s9 = scalar_lea.vmem %s209_s28, 8192 }
  0x23   : > { %p748_p8 = scmp.ne.s32.totalorder %s209_s28, %s747_s9  ;;  %s847_s30 = smov [#allocation6]  }
  0x24   : > { %s752_s5 = sshll.u32 %s847_s30, 4  ;;  %s753_s5 = int_to_ptr.vmem [resolvable:$false] %s752_s5 }
  0x25   : > { %p750_p11 = pnand %p748_p8, %p708_p10  ;;  %s754_s26 = scalar_lea.vmem %s753_s5, 16384 }
  0x26   : > { %p755_p13 = scmp.lt.s32.totalorder %s209_s28, %s753_s5  ;;  %p756_p0 = scmp.lt.s32.totalorder %s754_s26, %s747_s9 }
  0x27   : > { %p751_p12 = pneg %p750_p11 }
  0x28   : > { %p757_p1 = por %p756_p0, %p755_p13 }
  0x2a   : > { %p758_p2 = pnand %p757_p1, %p751_p12 }
  0x2c   : > { %761 = shalt.err (!%p758_p2)
}
  0x2d   : > { %s848_s7 = smov 1024   ;;  %s849_s8 = smov 512  }
  0x2e   : > { %s850_s10 = smov 32   ;;  %220 = sbr.rel (%p954_p6) target bundleno = 352 (0x160), region = 32 }
  0x2f   : > { %649 = dma.hbm_to_vmem [thread:$0]  (!%p936_p9), %s207_s22, 8192, %s209_s28, %s195_s4, %s848_s7, %s849_s8, %s850_s10  }
  0x30   : > { %s222_s25 = sand.u32 (!%p954_p6), 1, %s828_s13  }
  0x31   : > { %s624_s11 = sshll.u32 (!%p954_p6), %s222_s25, 5  ;;  %s223_s12 = scalar_lea.sflag (!%p954_p6), [#allocation4], %s222_s25 }
  0x32   : > { %s967_s20 = scalar_lea.vmem (!%p954_p6), [#allocation3], %s624_s11 }
  0x33   : > { %811 = dma.done.wait (%p918_p7), %s223_s12, 512  }
  0x34   : > { %813 = vsyncadd (%p918_p7), %s223_s12, 4294966784  ;;  %s625_s21 = sshll.u32 %s222_s25, 9  ;;  %s232_s27 = scalar_lea.sflag [#allocation7], %s222_s25 }
  0x35   : > { %s973_s6 = scalar_lea.vmem [#allocation6], %s625_s21 }
  0x36   : > { %815 = dma.done.wait (%p918_p7), %s232_s27, 8192  }
  0x37   : > { %817 = vsyncadd (%p918_p7), %s232_s27, 4294959104  ;;  %p626_p9 = scmp.ne.s32.totalorder %s836_s15, 0 }
  0x39   : > { %270 = sbr.rel (%p626_p9) target bundleno = 64 (0x40), region = 44 }
  0x3e   : > { %v851_v0 = vmov 0.0  }
  0x3f   : > { %271 = vst [vmem:[#allocation2] sm:$0xff] %v851_v0 }
  0x40 PF: > { %v338_v1 = vld [vmem:[%s973_s6 + $0x1e8] sm:$0xff]  ;;  %v340_v2 = vld [vmem:[%s973_s6 + $0x1f8] sm:$0xff]  ;;  %v337_v3 = vld [vmem:[%s973_s6 + $0x1e0] sm:$0xff]  ;;  %p627_p7 = scmp.ne.s32.totalorder %s836_s15, 1 }
  0x41   : > { %341 = vmatprep.subr.mxu0 %v338_v1  ;;  %411 = vmatprep.subr.mxu1 %v340_v2  ;;  %v339_v4 = vld [vmem:[%s973_s6 + $0x1f0] sm:$0xff]  ;;  %v334_v5 = vld [vmem:[%s973_s6 + $0x1c8] sm:$0xff]  ;;  %v336_v6 = vld [vmem:[%s973_s6 + $0x1d8] sm:$0xff] }
  0x42   : > { %342 = vmatpush1.xpose.msra.mxu0 %v337_v3  ;;  %412 = vmatpush1.xpose.msra.mxu1 %v339_v4  ;;  %v333_v7 = vld [vmem:[%s973_s6 + $0x1c0] sm:$0xff]  ;;  %v335_v8 = vld [vmem:[%s973_s6 + $0x1d0] sm:$0xff]  ;;  %v330_v9 = vld [vmem:[%s973_s6 + $0x1a8] sm:$0xff] }
  0x43   : > { %343 = vmatprep.subr.mxu0 %v334_v5  ;;  %413 = vmatprep.subr.mxu1 %v336_v6  ;;  %v332_v10 = vld [vmem:[%s973_s6 + $0x1b8] sm:$0xff]  ;;  %v329_v11 = vld [vmem:[%s973_s6 + $0x1a0] sm:$0xff]  ;;  %v331_v12 = vld [vmem:[%s973_s6 + $0x1b0] sm:$0xff] }
  0x44   : > { %v326_v13 = vld [vmem:[%s973_s6 + $0x188] sm:$0xff]  ;;  %v328_v14 = vld [vmem:[%s973_s6 + $0x198] sm:$0xff]  ;;  %v325_v15 = vld [vmem:[%s973_s6 + $0x180] sm:$0xff] }
  0x45   : > { %v327_v16 = vld [vmem:[%s973_s6 + $0x190] sm:$0xff]  ;;  %v322_v17 = vld [vmem:[%s973_s6 + $0x168] sm:$0xff]  ;;  %v324_v18 = vld [vmem:[%s973_s6 + $0x178] sm:$0xff] }
  0x46   : > { %344 = vmatpush1.xpose.msra.mxu0 %v333_v7  ;;  %414 = vmatpush1.xpose.msra.mxu1 %v335_v8  ;;  %v321_v19 = vld [vmem:[%s973_s6 + $0x160] sm:$0xff]  ;;  %v323_v20 = vld [vmem:[%s973_s6 + $0x170] sm:$0xff]  ;;  %v318_v21 = vld [vmem:[%s973_s6 + $0x148] sm:$0xff] }
  0x47   : > { %345 = vmatprep.subr.mxu0 %v330_v9  ;;  %415 = vmatprep.subr.mxu1 %v332_v10  ;;  %v320_v22 = vld [vmem:[%s973_s6 + $0x158] sm:$0xff]  ;;  %v317_v23 = vld [vmem:[%s973_s6 + $0x140] sm:$0xff]  ;;  %v319_v24 = vld [vmem:[%s973_s6 + $0x150] sm:$0xff] }
  0x48   : > { %v314_v25 = vld [vmem:[%s973_s6 + $0x128] sm:$0xff]  ;;  %v316_v26 = vld [vmem:[%s973_s6 + $0x138] sm:$0xff]  ;;  %v313_v29 = vld [vmem:[%s973_s6 + $0x120] sm:$0xff] }
  0x49   : > { %v274_v27 = vld [vmem:[%s967_s20 + $0x8] sm:$0xff]  ;;  %v276_v28 = vld [vmem:[%s967_s20 + $0x18] sm:$0xff]  ;;  %v315_v30 = vld [vmem:[%s973_s6 + $0x130] sm:$0xff] }
  0x4a   : > { %346 = vmatpush1.xpose.msra.mxu0 %v329_v11  ;;  %416 = vmatpush1.xpose.msra.mxu1 %v331_v12  ;;  %v310_v31 = vld [vmem:[%s973_s6 + $0x108] sm:$0xff]  ;;  %v312_v32 = vld [vmem:[%s973_s6 + $0x118] sm:$0xff]  ;;  %v309_v33 = vld [vmem:[%s973_s6 + $0x100] sm:$0xff] }
  0x4b   : > { %347 = vmatprep.subr.mxu0 %v326_v13  ;;  %417 = vmatprep.subr.mxu1 %v328_v14  ;;  %v311_v34 = vld [vmem:[%s973_s6 + $0x110] sm:$0xff]  ;;  %v306_v35 = vld [vmem:[%s973_s6 + $0xe8] sm:$0xff]  ;;  %v308_v36 = vld [vmem:[%s973_s6 + $0xf8] sm:$0xff] }
  0x4c   : > { %405 = vmatprep.mubr.f32.mxu0 %v274_v27  ;;  %475 = vmatprep.mubr.f32.mxu1 %v276_v28  ;;  %v305_v37 = vld [vmem:[%s973_s6 + $0xe0] sm:$0xff]  ;;  %v307_v38 = vld [vmem:[%s973_s6 + $0xf0] sm:$0xff]  ;;  %v302_v39 = vld [vmem:[%s973_s6 + $0xc8] sm:$0xff] }
  0x4d   : > { %v304_v40 = vld [vmem:[%s973_s6 + $0xd8] sm:$0xff]  ;;  %v301_v41 = vld [vmem:[%s973_s6 + $0xc0] sm:$0xff]  ;;  %v303_v42 = vld [vmem:[%s973_s6 + $0xd0] sm:$0xff] }
  0x4e   : > { %348 = vmatpush1.xpose.msra.mxu0 %v325_v15  ;;  %418 = vmatpush1.xpose.msra.mxu1 %v327_v16  ;;  %v298_v43 = vld [vmem:[%s973_s6 + $0xa8] sm:$0xff]  ;;  %v300_v44 = vld [vmem:[%s973_s6 + $0xb8] sm:$0xff]  ;;  %v297_v45 = vld [vmem:[%s973_s6 + $0xa0] sm:$0xff] }
  0x4f   : > { %349 = vmatprep.subr.mxu0 %v322_v17  ;;  %419 = vmatprep.subr.mxu1 %v324_v18  ;;  %v299_v46 = vld [vmem:[%s973_s6 + $0xb0] sm:$0xff]  ;;  %v294_v47 = vld [vmem:[%s973_s6 + $0x88] sm:$0xff]  ;;  %v296_v48 = vld [vmem:[%s973_s6 + $0x98] sm:$0xff] }
  0x50   : > { %v293_v49 = vld [vmem:[%s973_s6 + $0x80] sm:$0xff]  ;;  %v295_v50 = vld [vmem:[%s973_s6 + $0x90] sm:$0xff]  ;;  %v290_v51 = vld [vmem:[%s973_s6 + $0x68] sm:$0xff] }
  0x51   : > { %v292_v52 = vld [vmem:[%s973_s6 + $0x78] sm:$0xff]  ;;  %v289_v53 = vld [vmem:[%s973_s6 + $0x60] sm:$0xff]  ;;  %v291_v54 = vld [vmem:[%s973_s6 + $0x70] sm:$0xff] }
  0x52   : > { %350 = vmatpush1.xpose.msra.mxu0 %v321_v19  ;;  %420 = vmatpush1.xpose.msra.mxu1 %v323_v20  ;;  %v286_v55 = vld [vmem:[%s973_s6 + $0x48] sm:$0xff]  ;;  %v288_v56 = vld [vmem:[%s973_s6 + $0x58] sm:$0xff]  ;;  %v285_v57 = vld [vmem:[%s973_s6 + $0x40] sm:$0xff] }
  0x53   : > { %351 = vmatprep.subr.mxu0 %v318_v21  ;;  %421 = vmatprep.subr.mxu1 %v320_v22  ;;  %v287_v58 = vld [vmem:[%s973_s6 + $0x50] sm:$0xff]  ;;  %v282_v59 = vld [vmem:[%s973_s6 + $0x28] sm:$0xff]  ;;  %v284_v60 = vld [vmem:[%s973_s6 + $0x38] sm:$0xff] }
  0x54   : > { %v281_v61 = vld [vmem:[%s973_s6 + $0x20] sm:$0xff]  ;;  %v283_v62 = vld [vmem:[%s973_s6 + $0x30] sm:$0xff]  ;;  %v278_v63 = vld [vmem:[%s973_s6 + $0x8] sm:$0xff] }
  0x55   : > { %v280_v0 = vld [vmem:[%s973_s6 + $0x18] sm:$0xff]  ;;  %v277_v1 = vld [vmem:[%s973_s6] sm:$0xff]  ;;  %v279_v2 = vld [vmem:[%s973_s6 + $0x10] sm:$0xff] }
  0x56   : > { %352 = vmatpush1.xpose.msra.mxu0 %v317_v23  ;;  %422 = vmatpush1.xpose.msra.mxu1 %v319_v24  ;;  %v273_v3 = vld [vmem:[%s967_s20] sm:$0xff]  ;;  %v275_v4 = vld [vmem:[%s967_s20 + $0x10] sm:$0xff]  ;;  %v272_v6 = vld [vmem:[#allocation2] sm:$0xff] }
  0x57   : > { %353 = vmatprep.subr.mxu0 %v314_v25  ;;  %423 = vmatprep.subr.mxu1 %v316_v26 }
  0x5a   : > { %354 = vmatpush1.xpose.msra.mxu0 %v313_v29  ;;  %424 = vmatpush1.xpose.msra.mxu1 %v315_v30 }
  0x5b   : > { %355 = vmatprep.subr.mxu0 %v310_v31  ;;  %425 = vmatprep.subr.mxu1 %v312_v32 }
  0x5e   : > { %356 = vmatpush1.xpose.msra.mxu0 %v309_v33  ;;  %426 = vmatpush1.xpose.msra.mxu1 %v311_v34 }
  0x5f   : > { %357 = vmatprep.subr.mxu0 %v306_v35  ;;  %427 = vmatprep.subr.mxu1 %v308_v36 }
  0x62   : > { %358 = vmatpush1.xpose.msra.mxu0 %v305_v37  ;;  %428 = vmatpush1.xpose.msra.mxu1 %v307_v38 }
  0x63   : > { %359 = vmatprep.subr.mxu0 %v302_v39  ;;  %429 = vmatprep.subr.mxu1 %v304_v40 }
  0x66   : > { %360 = vmatpush1.xpose.msra.mxu0 %v301_v41  ;;  %430 = vmatpush1.xpose.msra.mxu1 %v303_v42 }
  0x67   : > { %361 = vmatprep.subr.mxu0 %v298_v43  ;;  %431 = vmatprep.subr.mxu1 %v300_v44 }
  0x6a   : > { %362 = vmatpush1.xpose.msra.mxu0 %v297_v45  ;;  %432 = vmatpush1.xpose.msra.mxu1 %v299_v46 }
  0x6b   : > { %363 = vmatprep.subr.mxu0 %v294_v47  ;;  %433 = vmatprep.subr.mxu1 %v296_v48 }
  0x6e   : > { %364 = vmatpush1.xpose.msra.mxu0 %v293_v49  ;;  %434 = vmatpush1.xpose.msra.mxu1 %v295_v50 }
  0x6f   : > { %365 = vmatprep.subr.mxu0 %v290_v51  ;;  %435 = vmatprep.subr.mxu1 %v292_v52 }
  0x72   : > { %366 = vmatpush1.xpose.msra.mxu0 %v289_v53  ;;  %436 = vmatpush1.xpose.msra.mxu1 %v291_v54 }
  0x73   : > { %367 = vmatprep.subr.mxu0 %v286_v55  ;;  %437 = vmatprep.subr.mxu1 %v288_v56 }
  0x76   : > { %368 = vmatpush1.xpose.msra.mxu0 %v285_v57  ;;  %438 = vmatpush1.xpose.msra.mxu1 %v287_v58 }
  0x77   : > { %369 = vmatprep.subr.mxu0 %v282_v59  ;;  %439 = vmatprep.subr.mxu1 %v284_v60 }
  0x7a   : > { %370 = vmatpush1.xpose.msra.mxu0 %v281_v61  ;;  %440 = vmatpush1.xpose.msra.mxu1 %v283_v62 }
  0x7b   : > { %371 = vmatprep.subr.mxu0 %v278_v63  ;;  %441 = vmatprep.subr.mxu1 %v280_v0 }
  0x7e   : > { %372 = vmatpush1.xpose.msra.mxu0 %v277_v1  ;;  %442 = vmatpush1.xpose.msra.mxu1 %v279_v2 }
  0x81   : > { %406 = vmatmul.mubr.f32.vlgmr.msra.gmra.mxu0 %v273_v3  ;;  %476 = vmatmul.mubr.f32.vlgmr.msra.gmra.mxu1 %v275_v4 }
 0x141   : > { %v407_v5 = vpop.f32.mrf.mxu0  ;;  %v477_v7 = vpop.f32.mrf.mxu1 }
 0x142   : > { %v478_v8 = vadd.f32 %v477_v7, %v407_v5  ;;  %486 = sbr.rel (%p627_p7) target bundleno = 337 (0x151), region = 48 }
 0x143   : > { %v409_v9 = vpop.f32.mrf.mxu0  ;;  %v479_v10 = vpop.f32.mrf.mxu1 }
 0x144   : > { %v481_v11 = vadd.f32 %v478_v8, %v272_v6 }
 0x146   : > { %482 = vst [vmem:[#allocation2] sm:$0xff] %v481_v11 }
 0x147   : > { %v628_v13 = vld [vmem:[%s1089_s2] ss:$0 sm:$0xff] }
 0x14d   : > { %v487_v12 = vld [vmem:[#allocation2] sm:$0xff] }
 0x14e   : > { %v495_v14 = vadd.f32 %v628_v13, %v487_v12 }
 0x150   : > { %496 = vst [vmem:[#allocation8] sm:$0xff] %v495_v14 }
 0x151 PF: > { %p1054_p10 = scmp.eq.s32.totalorder %s613_s18, 1  ;;  %s852_s29 = smov [#allocation8]  }
 0x152   : > { %s507_s4 = sshll.u32 %s852_s29, 4  ;;  %s508_s4 = int_to_ptr.vmem [resolvable:$true] %s507_s4 }
 0x153   : > { %s762_s15 = scalar_lea.vmem %s508_s4, 128  ;;  %p769_p6 = scmp.lt.s32.totalorder %s508_s4, %s508_s4 }
 0x154   : > { %p763_p3 = scmp.ne.s32.totalorder %s508_s4, %s762_s15  ;;  %p770_p8 = scmp.lt.s32.totalorder %s762_s15, %s762_s15 }
 0x156   : > { %p764_p4 = pnand %p763_p3, %p1054_p10  ;;  %p771_p11 = por %p770_p8, %p769_p6 }
 0x158   : > { %p765_p5 = pneg %p764_p4 }
 0x15a   : > { %p772_p12 = pnand %p771_p11, %p765_p5 }
 0x15c   : > { %775 = shalt.err (!%p772_p12)
}
 0x15d   : > { %640 = dma.vmem_to_hbm [thread:$0]  (%p1054_p10), %s508_s4, 128, %s1090_s3, [#allocation5]  }
 0x15e   : > { %819 = dma.done.wait (%p1054_p10), [#allocation5], 128  }
 0x15f   : > { %821 = vsyncadd (%p1054_p10), [#allocation5], 4294967168 }
 0x160 PF: > { %s20_s17 = sadd.s32 1, %s844_s17   ;;  %s1096_s12 = smov %s828_s13 }
 0x161   : > { %p17_p13 = scmp.ge.s32.totalorder %s20_s17, 4   ;;  %s1097_s13 = smov %s832_s14 }
 0x162   : > { %s1098_s14 = smov %s924_s24  ;;  %s1099_s15 = smov %s840_s16 }
 0x163   : > { %s1100_s16 = smov %s1102_s19  ;;  %19 = sbr.rel (!%p17_p13) target bundleno = 7 (0x7), region = 94 }
 0x168   :  { %520 = vsyncpa [#allocation4], 1 }
 0x169   :  { %522 = vsyncpa [#allocation4 + $0x1], 1 }
 0x16a   :  { %523 = vsyncpa [#allocation7], 1 }
 0x16b   :  { %525 = vsyncpa [#allocation7 + $0x1], 1 }
 0x16c   :  { %526 = vsyncpa [#allocation5], 1 }
 0x16d   :  { %528 = vsyncpa [#allocation5 + $0x1], 1 }

</bundles_post_ra>
